<compile_context>
chip_gen: v5e
topology: v5e:2x2
jax: 0.10.0
libtpu: 0.0.40
codegen_flags: <defaults>
</compile_context>

<pallas_src>
import numpy as np
import jax
import jax.numpy as jnp
from jax.experimental import pallas as pl
from jax.experimental.pallas import tpu as pltpu

NEG_SLOPE = 0.01  # PyTorch nn.LeakyReLU default


def _leaky_relu(x):
    return jnp.where(x > 0, x, NEG_SLOPE * x)


def _cdiv(a, b):
    return (a + b - 1) // b


def _round_up(a, b):
    return _cdiv(a, b) * b


def _decoder_kernel(h1pre_ref, side_ref, b1_ref, w2_ref, b2_ref, w3_ref, b3_ref,
                    out_ref, acc_ref):
    j = pl.program_id(1)

    @pl.when(j == 0)
    def _():
        acc_ref[...] = jnp.zeros_like(acc_ref)

    side = side_ref[...]                       # [2, tm] f32
    truth = side[0:1, :]                       # [1, tm]
    wnorm = side[1:2, :]                       # [1, tm]  (1/normalizer, 0 on padding)

    # layer 1: lrelu(h1pre + b1); per-row linear1 scale already folded into the
    # bf16 h1pre stream by the wrapper.
    h1 = _leaky_relu(h1pre_ref[...].astype(jnp.float32) + b1_ref[...])      # [D, tm]

    # layer 2 on the MXU, bf16 operands, f32 accumulate: [Dh, D] @ [D, tm]
    h2 = jnp.dot(w2_ref[...], h1.astype(jnp.bfloat16),
                 preferred_element_type=jnp.float32) + b2_ref[...]          # [Dh, tm]
    h2 = _leaky_relu(h2)

    # layer 3 (out_features=1): Dh-sublane reduce on the XLU instead of a
    # degenerate N=1 matmul
    o = jnp.sum(h2 * w3_ref[...], axis=0, keepdims=True) + b3_ref[...]      # [1, tm]

    diff = o - truth
    acc_ref[...] += diff * diff * wnorm                                     # [1, tm]

    @pl.when(j == pl.num_programs(1) - 1)
    def _():
        # per-core raw partial sum, broadcast lane-dense into a (1, 128) block
        out_ref[...] = jnp.broadcast_to(
            jnp.sum(acc_ref[...], keepdims=True), out_ref.shape)


def decoder_nll_pallas(h1preT, sideT, params, n_nodes, tm=8192, num_cores=2):
    """h1preT: [D, M] f32/bf16 factored layer-1 pre-activations (scale folded in);
    sideT: [2, M] f32 with rows [truth, 1/normalizer]."""
    D, M = h1preT.shape
    Dh = D // 2

    # M tile: multiple of 128 lanes, at most what one core needs
    per_core = _cdiv(M, num_cores)
    tm = int(min(tm, max(128, _round_up(per_core, 128))))
    n_inner = int(_cdiv(M, num_cores * tm))        # "arbitrary" steps per core
    M_pad = num_cores * n_inner * tm
    pad = M_pad - M
    if pad:
        # padded columns have wnorm == 0 -> zero contribution to the loss
        h1preT = jnp.pad(h1preT, ((0, 0), (0, pad)))
        sideT = jnp.pad(sideT, ((0, 0), (0, pad)))

    # PyTorch Linear stores weight [out, in]; transposed-stream layout consumes
    # w2 directly as [Dh, D] and the biases / w3 as sublane columns.
    b1 = params["b1"].reshape(D, 1).astype(jnp.float32)
    w2 = params["w2"].astype(jnp.bfloat16)                   # [Dh, D]
    b2 = params["b2"].reshape(Dh, 1).astype(jnp.float32)
    w3 = params["w3"].reshape(Dh, 1).astype(jnp.float32)
    b3 = params["b3"].reshape(1, 1).astype(jnp.float32)

    grid = (num_cores, n_inner)
    stream = lambda c, j: (0, c * n_inner + j)
    full = lambda c, j: (0, 0)

    out = pl.pallas_call(
        _decoder_kernel,
        out_shape=jax.ShapeDtypeStruct((1, num_cores * 128), jnp.float32),
        grid_spec=pltpu.PrefetchScalarGridSpec(
            num_scalar_prefetch=0,
            grid=grid,
            in_specs=[
                pl.BlockSpec((D, tm), stream),    # h1pre^T bf16 stream
                pl.BlockSpec((2, tm), stream),    # [truth | wnorm]^T
                pl.BlockSpec((D, 1), full),       # b1 column
                pl.BlockSpec((Dh, D), full),      # w2 (torch [out,in] layout)
                pl.BlockSpec((Dh, 1), full),      # b2 column
                pl.BlockSpec((Dh, 1), full),      # w3 column
                pl.BlockSpec((1, 1), full),       # b3
            ],
            out_specs=pl.BlockSpec((1, 128), lambda c, j: (0, c)),
            scratch_shapes=[pltpu.VMEM((1, tm), jnp.float32)],
        ),
        compiler_params=pltpu.CompilerParams(
            dimension_semantics=("parallel", "arbitrary")),
    )(h1preT.astype(jnp.bfloat16), sideT.astype(jnp.float32),
      b1, w2, b2, w3, b3)

    # sum the per-core partials; apply 1/N^2 here (no kernel recompile per N)
    partials = out.reshape(num_cores, 128)[:, 0]
    return jnp.sum(partials) / float(n_nodes * n_nodes)


def decoder_forward(embeddings, o_nodes, d_nodes, time_diffs, edge_ind,
                    od_matrix, output_len, params, n_nodes, tm=8192):
    """Reproduces Decoder.forward semantics, returning the scalar nll."""
    N = n_nodes
    emb = jnp.asarray(embeddings, jnp.float32)
    D = emb.shape[-1]

    o_np = np.asarray(o_nodes)
    d_np = np.asarray(d_nodes)

    # ---- negative-pair index construction (same numpy logic as the module) ----
    neg_mask = np.ones([N, N])
    neg_mask[o_np, d_np] = 0
    neg_mask = neg_mask.astype(bool)
    neg_o = np.arange(N).repeat(N)[neg_mask.reshape(-1)]
    neg_d = (np.arange(N).repeat(N).reshape([N, N])
             .transpose(1, 0).reshape(-1)[neg_mask.reshape(-1)])
    num_neg = int(neg_mask.sum())

    all_o = np.concatenate([o_np, neg_o]).astype(np.int32)
    all_d = np.concatenate([d_np, neg_d]).astype(np.int32)

    # ---- od_matrix zero replacement, normalizer gather ----
    od = jnp.asarray(od_matrix, dtype=jnp.float32)
    od = jnp.where(od == 0, 1.0, od)
    normalizer = od[all_o, all_d]                              # [M]

    # ---- linear1 scalar scaling of positive pairs (negatives unscaled) ----
    lin1_w = jnp.asarray(params["lin1_w"]).reshape(())
    lin1_b = jnp.asarray(params["lin1_b"]).reshape(())
    scale_pos = (jnp.asarray(time_diffs, jnp.float32) / output_len) * lin1_w + lin1_b

    truth = jnp.concatenate([jnp.asarray(edge_ind, jnp.float32),
                             jnp.zeros((num_neg,), jnp.float32)])
    wnorm = 1.0 / normalizer
    sideT = jnp.stack([truth, wnorm], axis=0)                  # [2, M]

    # ---- factored layer 1: pairs @ W1^T == emb[o] @ W1a + emb[d] @ W1b ----
    w1t = jnp.asarray(params["w1"], jnp.float32).T             # [2D, D]
    A = emb @ w1t[:D]                                          # [N, D]
    B = emb @ w1t[D:]                                          # [N, D]
    h1pre_pos = (A[o_np] + B[d_np]) * scale_pos[:, None]       # scale folded in f32
    h1pre_neg = A[neg_o] + B[neg_d]
    h1preT = jnp.concatenate([h1pre_pos, h1pre_neg], axis=0).T  # [D, M] f32

    return decoder_nll_pallas(h1preT, sideT, params, N, tm=tm)


def _reference_nll(embeddings, o_nodes, d_nodes, time_diffs, edge_ind,
                   od_matrix, output_len, params, n_nodes):
    """Pure-JAX f32 reference (mirrors the PyTorch forward)."""
    N = n_nodes
    o_np = np.asarray(o_nodes); d_np = np.asarray(d_nodes)
    neg_mask = np.ones([N, N]); neg_mask[o_np, d_np] = 0
    neg_mask = neg_mask.astype(bool)
    neg_o = np.arange(N).repeat(N)[neg_mask.reshape(-1)]
    neg_d = (np.arange(N).repeat(N).reshape([N, N])
             .transpose(1, 0).reshape(-1)[neg_mask.reshape(-1)])
    num_neg = int(neg_mask.sum())

    emb = jnp.asarray(embeddings, jnp.float32)
    lin1 = (jnp.asarray(time_diffs, jnp.float32)[:, None] / output_len) \
        * params["lin1_w"].reshape(()) + params["lin1_b"].reshape(())
    pos_pairs = jnp.concatenate([emb[o_np], emb[d_np]], axis=-1) * lin1
    neg_pairs = jnp.concatenate([emb[neg_o], emb[neg_d]], axis=-1)
    x = jnp.concatenate([pos_pairs, neg_pairs], axis=0)

    def lrelu(v):
        return jnp.where(v > 0, v, NEG_SLOPE * v)
    h = lrelu(x @ params["w1"].T + params["b1"])
    h = lrelu(h @ params["w2"].T + params["b2"])
    out = (h @ params["w3"].T + params["b3"]).reshape(-1)

    od = jnp.asarray(od_matrix, jnp.float32)
    od = jnp.where(od == 0, 1.0, od)
    normalizer = od[np.concatenate([o_np, neg_o]), np.concatenate([d_np, neg_d])]
    truth = jnp.concatenate([jnp.asarray(edge_ind, jnp.float32),
                             jnp.zeros((num_neg,), jnp.float32)])
    return jnp.sum((out - truth) ** 2 / normalizer) / (N * N)


if __name__ == "__main__":
    embedding_dim = 32
    n_nodes = 16
    n_edges = 8
    output_len = 10.0

    key = jax.random.PRNGKey(0)
    k = jax.random.split(key, 12)

    # deterministic parameter init (shapes from the module's __init__)
    params = {
        "lin1_w": jax.random.normal(k[0], (1, 1), jnp.float32) * 0.5,
        "lin1_b": jax.random.normal(k[1], (1,), jnp.float32) * 0.1,
        "w1": jax.random.normal(k[2], (embedding_dim, embedding_dim * 2), jnp.float32) * 0.1,
        "b1": jax.random.normal(k[3], (embedding_dim,), jnp.float32) * 0.1,
        "w2": jax.random.normal(k[4], (embedding_dim // 2, embedding_dim), jnp.float32) * 0.1,
        "b2": jax.random.normal(k[5], (embedding_dim // 2,), jnp.float32) * 0.1,
        "w3": jax.random.normal(k[6], (1, embedding_dim // 2), jnp.float32) * 0.1,
        "b3": jax.random.normal(k[7], (1,), jnp.float32) * 0.1,
    }

    # deterministic inputs
    embeddings = jax.random.normal(k[8], (n_nodes, embedding_dim), jnp.float32)

    # distinct (o, d) edge pairs
    perm = np.asarray(jax.random.permutation(k[9], n_nodes * n_nodes))[:n_edges]
    o_nodes = (perm // n_nodes).astype(np.int32)
    d_nodes = (perm % n_nodes).astype(np.int32)

    time_diffs = jnp.abs(jax.random.normal(k[10], (n_edges,), jnp.float32)) * 5.0
    edge_ind = jnp.abs(jax.random.normal(k[11], (n_edges,), jnp.float32)) * 3.0

    # od_matrix with some zeros (to exercise the od_matrix==0 -> 1 path)
    od_np = np.asarray(
        jax.random.randint(jax.random.PRNGKey(42), (n_nodes, n_nodes), 0, 5)
    ).astype(np.float32)

    nll = decoder_forward(embeddings, o_nodes, d_nodes, time_diffs, edge_ind,
                          od_np, output_len, params, n_nodes)
    nll = jax.block_until_ready(nll)

    ref = _reference_nll(embeddings, o_nodes, d_nodes, time_diffs, edge_ind,
                         od_np, output_len, params, n_nodes)
    ref = jax.block_until_ready(ref)

    # tolerance loosened vs the pure-f32 reference because the dominant stream
    # (factored layer-1 pre-activations) and the layer-2 MXU operands are bf16
    assert np.allclose(np.asarray(nll), np.asarray(ref), rtol=2e-2, atol=2e-3), \
        (float(nll), float(ref))
    print("KERNEL_OK")
</pallas_src>

<mosaic_0001>
module attributes {stable_mosaic.version = 11 : i64} {
  func.func @_decoder_kernel(%arg0: i32, %arg1: i32, %arg2: memref<32x128xbf16, #tpu.memory_space<vmem>>, %arg3: memref<2x128xf32, #tpu.memory_space<vmem>>, %arg4: memref<32x1xf32, #tpu.memory_space<vmem>>, %arg5: memref<16x32xbf16, #tpu.memory_space<vmem>>, %arg6: memref<16x1xf32, #tpu.memory_space<vmem>>, %arg7: memref<16x1xf32, #tpu.memory_space<vmem>>, %arg8: memref<1x1xf32, #tpu.memory_space<vmem>>, %arg9: memref<1x128xf32, #tpu.memory_space<vmem>>, %arg10: memref<1x128xf32, #tpu.memory_space<vmem>>) attributes {dimension_semantics = [#tpu.dimension_semantics<parallel>, #tpu.dimension_semantics<arbitrary>], iteration_bounds = array<i64: 2, 1>, scalar_prefetch = 0 : i64, scratch_operands = 1 : i64, tpu.core_type = #tpu.core_type<tc>, window_params = [{transform_indices = @transform_0, window_bounds = array<i64: 32, 128>}, {transform_indices = @transform_1, window_bounds = array<i64: 2, 128>}, {pipeline_mode = #tpu.pipeline_mode<synchronous>, transform_indices = @transform_2, window_bounds = array<i64: 32, 1>}, {pipeline_mode = #tpu.pipeline_mode<synchronous>, transform_indices = @transform_3, window_bounds = array<i64: 16, 32>}, {pipeline_mode = #tpu.pipeline_mode<synchronous>, transform_indices = @transform_4, window_bounds = array<i64: 16, 1>}, {pipeline_mode = #tpu.pipeline_mode<synchronous>, transform_indices = @transform_5, window_bounds = array<i64: 16, 1>}, {pipeline_mode = #tpu.pipeline_mode<synchronous>, transform_indices = @transform_6, window_bounds = array<i64: 1, 1>}, {transform_indices = @transform_7, window_bounds = array<i64: 1, 128>}]} {
    %c0_i32 = arith.constant 0 : i32
    %0 = arith.cmpi eq, %arg1, %c0_i32 : i32
    %1 = arith.extui %0 : i1 to i32
    %c0_i32_0 = arith.constant 0 : i32
    %2 = arith.cmpi ne, %1, %c0_i32_0 : i32
    scf.if %2 {
      %cst_25 = arith.constant 0.000000e+00 : f32
      %44 = vector.broadcast %cst_25 : f32 to vector<1x128xf32>
      %c0_26 = arith.constant 0 : index
      %c0_27 = arith.constant 0 : index
      %45 = vector.load %arg10[%c0_26, %c0_27] : memref<1x128xf32, #tpu.memory_space<vmem>>, vector<1x128xf32>
      tpu.vector_store %arg10[%c0_26, %c0_27], %44 {strides = array<i32>} : memref<1x128xf32, #tpu.memory_space<vmem>>, vector<1x128xf32>,
    } else {
    }
    %c0 = arith.constant 0 : index
    %c0_1 = arith.constant 0 : index
    %3 = vector.load %arg3[%c0, %c0_1] : memref<2x128xf32, #tpu.memory_space<vmem>>, vector<2x128xf32>
    %4 = vector.extract_strided_slice %3 {offsets = [0, 0], sizes = [1, 128], strides = [1, 1]} : vector<2x128xf32> to vector<1x128xf32>
    %5 = vector.extract_strided_slice %3 {offsets = [1, 0], sizes = [1, 128], strides = [1, 1]} : vector<2x128xf32> to vector<1x128xf32>
    %c0_2 = arith.constant 0 : index
    %c0_3 = arith.constant 0 : index
    %6 = vector.load %arg2[%c0_2, %c0_3] : memref<32x128xbf16, #tpu.memory_space<vmem>>, vector<32x128xbf16>
    %7 = arith.extf %6 : vector<32x128xbf16> to vector<32x128xf32>
    %c0_4 = arith.constant 0 : index
    %c0_5 = arith.constant 0 : index
    %8 = vector.load %arg4[%c0_4, %c0_5] : memref<32x1xf32, #tpu.memory_space<vmem>>, vector<32x1xf32>
    %9 = vector.broadcast %8 : vector<32x1xf32> to vector<32x128xf32>
    %10 = arith.addf %7, %9 : vector<32x128xf32>
    %cst = arith.constant 0.000000e+00 : f32
    %11 = vector.broadcast %cst : f32 to vector<32x128xf32>
    %12 = arith.cmpf ogt, %10, %11 : vector<32x128xf32>
    %cst_6 = arith.constant 0.00999999977 : f32
    %13 = vector.broadcast %cst_6 : f32 to vector<32x128xf32>
    %14 = arith.mulf %13, %10 : vector<32x128xf32>
    %15 = arith.select %12, %10, %14 : vector<32x128xi1>, vector<32x128xf32>
    %c0_7 = arith.constant 0 : index
    %c0_8 = arith.constant 0 : index
    %16 = vector.load %arg5[%c0_7, %c0_8] : memref<16x32xbf16, #tpu.memory_space<vmem>>, vector<16x32xbf16>
    %17 = arith.truncf %15 : vector<32x128xf32> to vector<32x128xbf16>
    %cst_9 = arith.constant dense<0.000000e+00> : vector<16x128xf32>
    %18 = tpu.matmul %16, %17, %cst_9 {dimension_numbers = #tpu.dot_dimension_numbers<[1], [0], [0], [1], [0, 0, 1, 1], [], []>} : vector<16x32xbf16>, vector<32x128xbf16>, vector<16x128xf32> -> vector<16x128xf32>
    %c0_10 = arith.constant 0 : index
    %c0_11 = arith.constant 0 : index
    %19 = vector.load %arg6[%c0_10, %c0_11] : memref<16x1xf32, #tpu.memory_space<vmem>>, vector<16x1xf32>
    %20 = vector.broadcast %19 : vector<16x1xf32> to vector<16x128xf32>
    %21 = arith.addf %18, %20 : vector<16x128xf32>
    %cst_12 = arith.constant 0.000000e+00 : f32
    %22 = vector.broadcast %cst_12 : f32 to vector<16x128xf32>
    %23 = arith.cmpf ogt, %21, %22 : vector<16x128xf32>
    %cst_13 = arith.constant 0.00999999977 : f32
    %24 = vector.broadcast %cst_13 : f32 to vector<16x128xf32>
    %25 = arith.mulf %24, %21 : vector<16x128xf32>
    %26 = arith.select %23, %21, %25 : vector<16x128xi1>, vector<16x128xf32>
    %c0_14 = arith.constant 0 : index
    %c0_15 = arith.constant 0 : index
    %27 = vector.load %arg7[%c0_14, %c0_15] : memref<16x1xf32, #tpu.memory_space<vmem>>, vector<16x1xf32>
    %28 = vector.broadcast %27 : vector<16x1xf32> to vector<16x128xf32>
    %29 = arith.mulf %26, %28 : vector<16x128xf32>
    %cst_16 = arith.constant dense<0.000000e+00> : vector<128xf32>
    %30 = vector.multi_reduction <add>, %29, %cst_16 [0] : vector<16x128xf32> to vector<128xf32>
    %31 = vector.shape_cast %30 : vector<128xf32> to vector<1x128xf32>
    %c0_17 = arith.constant 0 : index
    %c0_18 = arith.constant 0 : index
    %32 = vector.load %arg8[%c0_17, %c0_18] : memref<1x1xf32, #tpu.memory_space<vmem>>, vector<1x1xf32>
    %33 = vector.broadcast %32 : vector<1x1xf32> to vector<1x128xf32>
    %34 = arith.addf %31, %33 : vector<1x128xf32>
    %35 = arith.subf %34, %4 : vector<1x128xf32>
    %c0_19 = arith.constant 0 : index
    %c0_20 = arith.constant 0 : index
    %36 = vector.load %arg10[%c0_19, %c0_20] : memref<1x128xf32, #tpu.memory_space<vmem>>, vector<1x128xf32>
    %37 = arith.mulf %35, %35 : vector<1x128xf32>
    %38 = arith.mulf %37, %5 : vector<1x128xf32>
    %39 = arith.addf %36, %38 : vector<1x128xf32>
    %c0_21 = arith.constant 0 : index
    %c0_22 = arith.constant 0 : index
    %40 = vector.load %arg10[%c0_21, %c0_22] : memref<1x128xf32, #tpu.memory_space<vmem>>, vector<1x128xf32>
    tpu.vector_store %arg10[%c0_21, %c0_22], %39 {strides = array<i32>} : memref<1x128xf32, #tpu.memory_space<vmem>>, vector<1x128xf32>,
    %c0_i32_23 = arith.constant 0 : i32
    %41 = arith.cmpi eq, %arg1, %c0_i32_23 : i32
    %42 = arith.extui %41 : i1 to i32
    %c0_i32_24 = arith.constant 0 : i32
    %43 = arith.cmpi ne, %42, %c0_i32_24 : i32
    scf.if %43 {
      %c0_25 = arith.constant 0 : index
      %c0_26 = arith.constant 0 : index
      %44 = vector.load %arg10[%c0_25, %c0_26] : memref<1x128xf32, #tpu.memory_space<vmem>>, vector<1x128xf32>
      %45 = vector.shape_cast %44 : vector<1x128xf32> to vector<1x1x128xf32>
      %cst_27 = arith.constant dense<0.000000e+00> : vector<1xf32>
      %46 = vector.multi_reduction <add>, %45, %cst_27 [1, 2] : vector<1x1x128xf32> to vector<1xf32>
      %47 = vector.shape_cast %46 : vector<1xf32> to vector<1x1x1xf32>
      %48 = vector.extract %47[0, 0, 0] : f32 from vector<1x1x1xf32>
      %49 = vector.broadcast %48 : f32 to vector<1x1xf32>
      %50 = vector.shape_cast %49 : vector<1x1xf32> to vector<1x1xf32>
      %51 = vector.broadcast %50 : vector<1x1xf32> to vector<1x128xf32>
      %c0_28 = arith.constant 0 : index
      %c0_29 = arith.constant 0 : index
      %52 = vector.load %arg9[%c0_28, %c0_29] : memref<1x128xf32, #tpu.memory_space<vmem>>, vector<1x128xf32>
      tpu.vector_store %arg9[%c0_28, %c0_29], %51 {strides = array<i32>} : memref<1x128xf32, #tpu.memory_space<vmem>>, vector<1x128xf32>,
    } else {
    }
    return
  }
  func.func @transform_0(%arg0: i32, %arg1: i32) -> (i32, i32) {
    %c1_i32 = arith.constant 1 : i32
    %0 = arith.muli %arg0, %c1_i32 : i32
    %1 = arith.addi %0, %arg1 : i32
    %c0_i32 = arith.constant 0 : i32
    %c0_i32_0 = arith.constant 0 : i32
    return %c0_i32, %1 : i32, i32
  }
  func.func @transform_1(%arg0: i32, %arg1: i32) -> (i32, i32) {
    %c1_i32 = arith.constant 1 : i32
    %0 = arith.muli %arg0, %c1_i32 : i32
    %1 = arith.addi %0, %arg1 : i32
    %c0_i32 = arith.constant 0 : i32
    %c0_i32_0 = arith.constant 0 : i32
    return %c0_i32, %1 : i32, i32
  }
  func.func @transform_2(%arg0: i32, %arg1: i32) -> (i32, i32) {
    %c0_i32 = arith.constant 0 : i32
    %c0_i32_0 = arith.constant 0 : i32
    %c0_i32_1 = arith.constant 0 : i32
    return %c0_i32, %c0_i32_0 : i32, i32
  }
  func.func @transform_3(%arg0: i32, %arg1: i32) -> (i32, i32) {
    %c0_i32 = arith.constant 0 : i32
    %c0_i32_0 = arith.constant 0 : i32
    %c0_i32_1 = arith.constant 0 : i32
    return %c0_i32, %c0_i32_0 : i32, i32
  }
  func.func @transform_4(%arg0: i32, %arg1: i32) -> (i32, i32) {
    %c0_i32 = arith.constant 0 : i32
    %c0_i32_0 = arith.constant 0 : i32
    %c0_i32_1 = arith.constant 0 : i32
    return %c0_i32, %c0_i32_0 : i32, i32
  }
  func.func @transform_5(%arg0: i32, %arg1: i32) -> (i32, i32) {
    %c0_i32 = arith.constant 0 : i32
    %c0_i32_0 = arith.constant 0 : i32
    %c0_i32_1 = arith.constant 0 : i32
    return %c0_i32, %c0_i32_0 : i32, i32
  }
  func.func @transform_6(%arg0: i32, %arg1: i32) -> (i32, i32) {
    %c0_i32 = arith.constant 0 : i32
    %c0_i32_0 = arith.constant 0 : i32
    %c0_i32_1 = arith.constant 0 : i32
    return %c0_i32, %c0_i32_0 : i32, i32
  }
  func.func @transform_7(%arg0: i32, %arg1: i32) -> (i32, i32) {
    %c0_i32 = arith.constant 0 : i32
    %c0_i32_0 = arith.constant 0 : i32
    return %c0_i32, %arg0 : i32, i32
  }
}

</mosaic_0001>

<bundles_post_ra>
// kernel: tpu_custom_call.1
= control target key start
LH: loop header
LB: loop body
LE: loop exit
PB: predicated region body
PF: predicated region fallthrough
CT: control target
= control target key end

     0   :  { %s975_s0 = inlined_call_operand.vmem [shape: bf16[32,256], index: 0, kind: input, shape index: {}]   ;;  %s976_s1 = inlined_call_operand.vmem [shape: f32[2,256], index: 1, kind: input, shape index: {}]   ;;  %s977_s2 = inlined_call_operand.vmem [shape: f32[32,1], index: 2, kind: input, shape index: {}]   ;;  %s978_s3 = inlined_call_operand.vmem [shape: bf16[16,32], index: 3, kind: input, shape index: {}]   ;;  %s979_s4 = inlined_call_operand.vmem [shape: f32[16,1], index: 4, kind: input, shape index: {}]   ;;  %s980_s5 = inlined_call_operand.vmem [shape: f32[16,1], index: 5, kind: input, shape index: {}]   ;;  %s981_s6 = inlined_call_operand.<no memory space> [shape: f32[1,1], index: 6, kind: input, shape index: {}]   ;;  %s982_s7 = inlined_call_operand.hbm [shape: f32[1,256], index: 7, kind: output, shape index: {}]  }
   0x1   :  { %v12_v0 = vstv %s981_s6 }
   0x2   :  { %13 = vst [vmem:[#allocation3] sm:$0x1] %v12_v0 }
   0x3   :  { %14 = vsyncpa [#allocation6], 0 }
   0x4   :  { %16 = vsyncpa [#allocation6 + $0x1], 0  ;;  %s836_s26 = smov 0   ;;  %s838_s27 = smov 0  }
   0x5   :  { %s840_s28 = smov 0   ;;  %s842_s29 = smov 0  }
   0x6   :  { %s844_s30 = smov 0   ;;  %s846_s8 = smov 0  }
   0x7 LB: > { %s623_s6 = sadd.s32 4294967295, %s789_s8   ;;  %s624_s9 = sadd.s32 4294967294, %s789_s8   ;;  %s789_s8 = sphi %s846_s8, %s22_s8   ;;  %s785_s30 = sphi %s844_s30, %s989_s30   ;;  %s781_s29 = sphi %s842_s29, %s988_s29   ;;  %s777_s28 = sphi %s840_s28, %s987_s28   ;;  %s773_s27 = sphi %s838_s27, %s986_s27   ;;  %s769_s26 = sphi %s836_s26, %s985_s26  }
   0x8   : > { %s34_s10 = sadd.s32 1, %s785_s30  ;;  %s43_s11 = sadd.s32 1, %s777_s28 }
   0x9   : > { %p36_p0 = scmp.ge.s32.totalorder %s34_s10, 2  ;;  %p50_p1 = scmp.ne.s32.totalorder %s777_s28, %s773_s27 }
   0xa   : > { %p51_p2 = scmp.eq.s32.totalorder %s789_s8, 0  ;;  %p213_p3 = scmp.eq.s32.totalorder %s623_s6, 1 }
   0xb   : > { %s991_s10 = smov (%p36_p0, %s34_s10), 0  ;;  %p218_p6 = scmp.ne.s32.totalorder %s773_s27, %s769_s26 }
   0xc   : > { %p52_p4 = por %p51_p2, %p50_p1  ;;  %p875_p5 = por %p213_p3, %p50_p1 }
   0xd   : > { %s40_s13 = ssub.s32 %s785_s30, %s991_s10  ;;  %p219_p8 = scmp.eq.s32.totalorder %s624_s9, 1 }
   0xe   : > { %p41_p7 = scmp.eq.s32.totalorder %s40_s13, 0  ;;  %p626_p10 = scmp.ge.s32.totalorder %s789_s8, 2 }
   0xf   : > { %p886_p9 = por %p219_p8, %p218_p6 }
  0x10   : > { %s884_s14 = scalar_select %p41_p7, %s777_s28, %s43_s11  }
  0x11   : > { %250 = sbr.rel (%p626_p10) target bundleno = 30 (0x1e), region = 36 }
  0x16   : > { %253 = sbr.rel (!%p52_p4) target bundleno = 30 (0x1e), region = 40  ;;  %s255_s16 = sand.u32 (%p52_p4), 1, %s777_s28  }
  0x17   : > { %s628_s17 = sshll.u32 (%p52_p4), %s785_s30, 2  ;;  %s627_s18 = sshll.u32 (%p52_p4), %s255_s16, 4 }
  0x18   : > { %s260_s21 = scalar_lea.vmem (%p52_p4), %s975_s0, %s628_s17  ;;  %s257_s22 = scalar_lea.vmem (%p52_p4), [#allocation4], %s627_s18 }
  0x19   : > { %v277_v1 = vld [vmem:[%s260_s21] sm:$0xf] (%p52_p4)  ;;  %v279_v2 = vld [vmem:[%s260_s21 + $0x8] sm:$0xf] (%p52_p4)  ;;  %v281_v3 = vld [vmem:[%s260_s21 + $0x10] sm:$0xf] (%p52_p4) }
  0x1a   : > { %278 = vst [vmem:[%s257_s22] sm:$0xf] (%p52_p4), %v277_v1  ;;  %v283_v4 = vld [vmem:[%s260_s21 + $0x18] sm:$0xf] (%p52_p4) }
  0x1b   : > { %280 = vst [vmem:[%s257_s22 + $0x4] sm:$0xf] %v279_v2 }
  0x1c   : > { %282 = vst [vmem:[%s257_s22 + $0x8] sm:$0xf] %v281_v3 }
  0x1d   : > { %284 = vst [vmem:[%s257_s22 + $0xc] sm:$0xf] %v283_v4 }
  0x1e PF: > { %p629_p11 = scmp.ge.s32.totalorder %s789_s8, 1  ;;  %p324_p12 = scmp.lt.s32.totalorder %s789_s8, 3 }
  0x20   : > { %p325_p13 = pnand %p629_p11, %p324_p12 }
  0x21   : > { %s919_s21 = sand.u32 (!%p325_p13), 1, %s773_s27   ;;  %p368_p0 = scmp.lt.s32.totalorder (!%p325_p13), %s781_s29, 1 }
  0x22   : > { %328 = sbr.rel (%p325_p13) target bundleno = 534 (0x216), region = 85  ;;  %s630_s24 = sshll.u32 (!%p325_p13), %s919_s21, 4 }
  0x23   : > { %s333_s9 = scalar_lea.vmem (!%p325_p13), [#allocation4], %s630_s24  ;;  %s537_s24 = scalar_lea.hbm (!%p325_p13), %s982_s7, %s781_s29 }
  0x24   : > { %s365_s25 = scalar_lea.vmem (!%p325_p13), [#allocation5], %s919_s21  ;;  %s529_s13 = scalar_lea.sflag (!%p325_p13), [#allocation6], %s919_s21 }
  0x25   : > { %s539_s6 = sshll.u32 (!%p325_p13), %s365_s25, 4  ;;  %s540_s6 = int_to_ptr.vmem [resolvable:$true] %s539_s6 }
  0x27   : > { %v390_v5 = vld [vmem:[%s977_s2 + $0x10] sm:$0xff]  ;;  %v388_v6 = vld [vmem:[%s977_s2] sm:$0xff]  ;;  %v791_v7 = vmov 0   ;;  %v391_v8 = vld [vmem:[%s977_s2 + $0x18] sm:$0xff]  ;;  %vm449_vm4 = vcmask 261120   ;;  %v792_v40 = vmov 0.0  }
  0x28   : > { %709 = vset.pattern.permute.xlu1 %v791_v7  ;;  %708 = vset.pattern.permute.xlu0 %v791_v7  ;;  %v389_v9 = vld [vmem:[%s977_s2 + $0x8] sm:$0xff]  ;;  %v473_v10 = vld [vmem:[%s980_s5] sm:$0xff]  ;;  %378 = vst [vmem:[#allocation2] sm:$0x1] %v792_v40  ;;  %s369_s16 = scalar_select %p368_p0, %s781_s29, 1  ;;  %vm515_vm7 = vcmask 1040384  }
  0x29   : > { %404 = vperm.xlu0 %708, %v390_v5   ;;  %394 = vperm.xlu1 %709, %v388_v6   ;;  %v474_v11 = vld [vmem:[%s980_s5 + $0x8] sm:$0xff]  ;;  %v432_v12 = vld [vmem:[%s979_s4] sm:$0xff]  ;;  %s731_s29 = scalar_lea.hbm %s982_s7, 2 }
  0x2a   : > { %710 = vset.pattern.permute.xlu2 %v791_v7  ;;  %v433_v13 = vld [vmem:[%s979_s4 + $0x8] sm:$0xff]  ;;  %v494_v23 = vld [vmem:[#allocation3] sm:$0x1]  ;;  %s631_s17 = sshll.u32 %s369_s16, 1 }
  0x2b   : > { %436 = vperm.xlu2 %710, %v432_v12   ;;  %v648_v14 = vld [vmem:[%s333_s9 + $0x8] sm:$0xff]   ;;  %v641_v18 = vld [vmem:[%s333_s9] sm:$0xff]   ;;  %s371_s20 = scalar_lea.vmem %s976_s1, %s631_s17  ;;  %s541_s9 = sshll.u32 %s537_s24, 4  ;;  %s542_s9 = int_to_ptr.hbm [resolvable:$true] %s541_s9 }
  0x2c   : > { %v646_v17 = vunpack.c.l.bf16 %v648_v14  ;;  %v642_v20 = vunpack.c.l.bf16 %v641_v18  ;;  %v647_v21 = vunpack.c.h.bf16 %v648_v14  ;;  %v643_v22 = vunpack.c.h.bf16 %v641_v18  ;;  %v639_v39 = vld [vmem:[%s978_s3] sm:$0xff]  ;;  %s725_s16 = sshra.s32 %s542_s9, 4  ;;  %s726_s16 = int_to_ptr.hbm [resolvable:$true] %s725_s16 }
  0x2d   : > { %v379_v0 = vld [vmem:[%s371_s20] sm:$0x3]  ;;  %s727_s17 = scalar_lea.hbm %s726_s16, 1  ;;  %p732_p4 = scmp.lt.s32.totalorder %s726_s16, %s982_s7 }
  0x2e   : > { %v506_v3 = vrot.slane %v379_v0, 1  ;;  %p728_p1 = scmp.ne.s32.totalorder %s726_s16, %s727_s17  ;;  %p733_p6 = scmp.lt.s32.totalorder %s731_s29, %s727_s17 }
  0x2f   : > { %v503_v5 = vld [vmem:[#allocation2] sm:$0x1] }
  0x30   : > { %p729_p2 = pnand %p728_p1, %p875_p5  ;;  %p734_p7 = por %p733_p6, %p732_p4 }
  0x31   : > { %409 = vperm.xlu0 %708, %v391_v8   ;;  %399 = vperm.xlu1 %709, %v389_v9  }
  0x32   : > { %p730_p3 = pneg %p729_p2 }
  0x33   : > { %441 = vperm.xlu2 %710, %v433_v13  }
  0x34   : > { %p735_p8 = pnand %p734_p7, %p730_p3 }
  0x39   : > { %477 = vperm.xlu0 %708, %v473_v10   ;;  %482 = vperm.xlu1 %709, %v474_v11  }
  0x3b   : > { %497 = vperm.xlu2 %710, %v494_v23  }
  0x85   : > { %v437_v41 = vpop.permute.xlu2 %436 }
  0x8d   : > { %v442_v45 = vpop.permute.xlu2 %441 }
  0x95   : > { %v498_v60 = vpop.permute.xlu2 %497 }
  0x96   : > { %v500_v62 = vperm.slane %v498_v60, 0 }
  0x9b   : > { %v405_v15 = vpop.permute.xlu0 %404  ;;  %v395_v16 = vpop.permute.xlu1 %394 }
  0x9c   : > { %v414_v19 = vadd.f32 %v646_v17, %v405_v15  ;;  %v412_v27 = vadd.f32 %v642_v20, %v395_v16 }
  0x9e   : > { %v422_v26 = vmul.f32 0.01, %v414_v19  ;;  %vm418_vm0 = vcmp.gt.f32.partialorder %v414_v19, 0.0  ;;  %v420_v32 = vmul.f32 0.01, %v412_v27  ;;  %vm416_vm3 = vcmp.gt.f32.partialorder %v412_v27, 0.0 }
  0xa0   : > { %v426_v33 = vsel %vm418_vm0, %v414_v19, %v422_v26  ;;  %v424_v37 = vsel %vm416_vm3, %v412_v27, %v420_v32 }
  0xa3   : > { %v410_v24 = vpop.permute.xlu0 %409  ;;  %v400_v25 = vpop.permute.xlu1 %399 }
  0xa4   : > { %v415_v28 = vadd.f32 %v647_v21, %v410_v24  ;;  %v413_v29 = vadd.f32 %v643_v22, %v400_v25 }
  0xa6   : > { %v423_v30 = vmul.f32 0.01, %v415_v28  ;;  %v421_v31 = vmul.f32 0.01, %v413_v29  ;;  %vm419_vm1 = vcmp.gt.f32.partialorder %v415_v28, 0.0  ;;  %vm417_vm2 = vcmp.gt.f32.partialorder %v413_v29, 0.0 }
  0xa8   : > { %v427_v34 = vsel %vm419_vm1, %v415_v28, %v423_v30  ;;  %v425_v36 = vsel %vm417_vm2, %v413_v29, %v421_v31 }
  0xa9   : > { %v431_v35 = vpack.c.bf16 %v427_v34, %v426_v33  ;;  %v430_v38 = vpack.c.bf16 %v425_v36, %v424_v37 }
  0xab   : > { %459 = vmatpush.bf16.msra.mxu0 %v431_v35  ;;  %v478_v50 = vpop.permute.xlu0 %477  ;;  %v483_v51 = vpop.permute.xlu1 %482 }
  0xaf   : > { %460 = vmatpush.bf16.msra.mxu0 %v430_v38 }
  0xb2   : > { %636 = vmatmul.msk.bf16.vlgmr.msra.gmra.mxu0 %vm449_vm4, %v639_v39 }
 0x12f   : > { %v462_v42 = vpop.f32.mrf.mxu0 }
 0x130   : > { %v463_v43 = vadd.f32 %v462_v42, %v437_v41 }
 0x132   : > { %v469_v44 = vmul.f32 0.01, %v463_v43  ;;  %vm467_vm5 = vcmp.gt.f32.partialorder %v463_v43, 0.0 }
 0x134   : > { %v471_v48 = vsel %vm467_vm5, %v463_v43, %v469_v44 }
 0x135   : > { %v485_v53 = vmul.f32 %v478_v50, %v471_v48 }
 0x137   : > { %v464_v46 = vpop.f32.mrf.mxu0 }
 0x138   : > { %v465_v47 = vadd.f32 %v464_v46, %v442_v45 }
 0x13a   : > { %vm468_vm6 = vcmp.gt.f32.partialorder %v465_v47, 0.0  ;;  %v470_v49 = vmul.f32 0.01, %v465_v47 }
 0x13c   : > { %v472_v52 = vsel %vm468_vm6, %v465_v47, %v470_v49 }
 0x13d   : > { %v486_v54 = vmul.f32 %v483_v51, %v472_v52 }
 0x13f   : > { %v487_v55 = vadd.f32 %v486_v54, %v485_v53 }
 0x141   : > { %v488_v56 = vrot.slane %v487_v55, 4 }
 0x143   : > { %v489_v57 = vadd.f32 %v488_v56, %v487_v55 }
 0x145   : > { %v490_v58 = vrot.slane %v489_v57, 2 }
 0x147   : > { %v491_v59 = vadd.f32 %v490_v58, %v489_v57 }
 0x149   : > { %v492_v61 = vrot.slane %v491_v59, 1 }
 0x14b   : > { %v493_v63 = vadd.f32 %v492_v61, %v491_v59 }
 0x14d   : > { %v501_v1 = vadd.f32 %v500_v62, %v493_v63 }
 0x14f   : > { %v502_v2 = vsub.f32 %v501_v1, %v379_v0 }
 0x151   : > { %v504_v4 = vmul.f32 %v502_v2, %v502_v2 }
 0x153   : > { %v508_v6 = vmul.f32 %v506_v3, %v504_v4 }
 0x155   : > { %v509_v7 = vadd.f32 %v508_v6, %v503_v5 }
 0x157   : > { %510 = vst [vmem:[#allocation2] sm:$0x1] %v509_v7 }
 0x15e   : > { %v514_v8 = vld [vmem:[#allocation2] sm:$0x1] }
 0x15f   : > { %v516_v9 = vsel %vm515_vm7, %v514_v8, 0.0 }
 0x160   : > { %517 = vadd.xlane.f32.xlu0 %v516_v9 }
 0x1d3   : > { %v518_v10 = vpop.xlane.xlu0 %517 }
 0x1d4   : > { %v519_v11 = vrot.slane %v518_v10, 4 }
 0x1d6   : > { %v520_v12 = vadd.f32 %v519_v11, %v518_v10 }
 0x1d8   : > { %v521_v13 = vrot.slane %v520_v12, 2 }
 0x1da   : > { %v522_v14 = vadd.f32 %v521_v13, %v520_v12 }
 0x1dc   : > { %v523_v15 = vrot.slane %v522_v14, 1 }
 0x1de   : > { %v524_v16 = vadd.f32 %v523_v15, %v522_v14 }
 0x1e0   : > { %649 = vpush %v524_v16 }
 0x211   : > { %s650_s11 = spop %649 }
 0x212   : > { %v526_v17 = vstv %s650_s11 }
 0x213   : > { %527 = vst [vmem:[%s365_s25] sm:$0x1] %v526_v17 }
 0x214   : > { %738 = shalt.err (!%p735_p8)
}
 0x215   : > { %651 = dma.vmem_to_hbm [thread:$0]  (%p875_p5), %s540_s6, 16, %s542_s9, %s529_s13  }
 0x216 PF: > { %s553_s21 = sand.u32 1, %s769_s26   ;;  %p654_p11 = pnand %p626_p10, %p886_p9 }
 0x217   : > { %s554_s23 = scalar_lea.sflag [#allocation6], %s553_s21 }
 0x218   : > { %p655_p12 = pneg %p654_p11 }
 0x21a   : > { %764 = dma.done.wait (%p655_p12), %s554_s23, 16  }
 0x21b   : > { %766 = vsyncadd (%p655_p12), %s554_s23, 4294967280  ;;  %s22_s8 = sadd.s32 1, %s789_s8   ;;  %s985_s26 = smov %s773_s27 }
 0x21c   : > { %p19_p13 = scmp.ge.s32.totalorder %s22_s8, 4   ;;  %s986_s27 = smov %s777_s28 }
 0x21d   : > { %s987_s28 = smov %s884_s14  ;;  %s988_s29 = smov %s785_s30 }
 0x21e   : > { %s989_s30 = smov %s991_s10  ;;  %21 = sbr.rel (!%p19_p13) target bundleno = 7 (0x7), region = 140 }
 0x223   :  { %559 = vsyncpa [#allocation6], 1 }
 0x224   :  { %561 = vsyncpa [#allocation6 + $0x1], 1 }

</bundles_post_ra>
